<compile_context>
chip_gen: v6e
topology: v6e:2x2x1
jax: 0.10.0
libtpu: 0.0.40
codegen_flags: <defaults>
</compile_context>

<pallas_src>
import functools

import jax
import jax.numpy as jnp
from jax import lax
from jax.experimental import pallas as pl
from jax.experimental.pallas import tpu as pltpu

_LANE = 128          # vreg lane width  (batch -> lanes)
_SUB = 8             # vreg sublane width (extra batch chunks -> sublanes)
_UNROLL_MAX_T = 128  # fully unroll the time loop for small / fixed T


def _wealth_rnn_kernel(params_ref, x_ref, ret_ref, out_ref, *,
                       seq_len, approx_recip):
    """One (T, s_tile, 128) batch slab; entire time recurrence in-kernel."""
    # -- prologue: scalar params (SMEM) read once; derived consts precomputed --
    w_in = params_ref[0]     # rnn.input_param.weight   (zeros(1,1))
    w_h = params_ref[1]      # rnn.hidden_param.weight  (ones(1,1))
    c_gate = params_ref[2]   # pi_bar - hidden_param.bias
    w1 = params_ref[3]       # rnn.fc1_param.weight     (-1*ones(1,1))
    c_fc1 = params_ref[4]    # 2 * hidden_param.bias
    w2 = params_ref[5]       # rnn.fc2_param.weight     (-1*ones(1,1))
    c_out = params_ref[6]    # pi_bar + hidden_param.bias

    def step(x, r, h):
        # hidden * (1 + myret) / (1 + hidden * myret)
        num = h * (1.0 + r)
        den = 1.0 + h * r
        if approx_recip:
            h_adj = num * pl.reciprocal(den, approx=True)   # EUP slot
        else:
            h_adj = num / den                               # exact (torch math)
        # recurrence() from NoTradeRegionRNN; 1x1 "linears" -> scalar VPU mults
        ingate = x * w_in + w_h * h_adj - c_gate
        ingate2 = w1 * jnp.maximum(ingate, 0.0) + c_fc1
        return w2 * jnp.maximum(ingate2, 0.0) + c_out

    # t == 0: hidden = input[0] (broadcast over the size-1 hidden dim)
    h = x_ref[0]                       # (s_tile, 128)
    out_ref[0] = h

    if seq_len <= _UNROLL_MAX_T:
        # fully unrolled: static indices, straight-line code for the scheduler
        for t in range(1, seq_len):
            h = step(x_ref[t], ret_ref[t - 1], h)
            out_ref[t] = h
    else:
        def body(t, h):
            h = step(x_ref[t], ret_ref[t - 1], h)
            out_ref[t] = h
            return h
        lax.fori_loop(1, seq_len, body, h)


def wealth_rnn_forward(inputs, target, returns, params, *, approx_recip=False):
    """Returns (output, hidden) like NoTradeRegionRNN/WealthRNN forward."""
    T, B, I = inputs.shape
    H = 1   # module only works with hidden_size == input_size == 1
    assert I == 1, "WealthRNN only supports input_size == hidden_size == 1"

    # Batch -> (sublane, lane) layout.  Padded elements see x=0, r=0, so the
    # denominator 1 + h*r == 1 everywhere (no div-by-zero); padding is sliced
    # off after the call.
    s_total = -(-B // _LANE)
    if s_total <= _SUB:
        s_pad, s_tile = s_total, s_total          # full-dim block (no 8-div need)
    else:
        s_pad = -(-s_total // _SUB) * _SUB
        s_tile = _SUB
    b_pad = s_pad * _LANE

    x2 = jnp.pad(inputs.reshape(T, B).astype(jnp.float32),
                 ((0, 0), (0, b_pad - B))).reshape(T, s_pad, _LANE)
    r2 = jnp.pad(returns.reshape(T - 1, B).astype(jnp.float32),
                 ((0, 0), (0, b_pad - B))).reshape(T - 1, s_pad, _LANE)

    pi_bar = jnp.asarray(target, jnp.float32)
    w_in = jnp.asarray(params["w_in"], jnp.float32)
    w_h = jnp.asarray(params["w_h"], jnp.float32)
    b_h = jnp.asarray(params["b_h"], jnp.float32)
    w1 = jnp.asarray(params["w1"], jnp.float32)
    w2 = jnp.asarray(params["w2"], jnp.float32)
    p = jnp.stack([w_in, w_h, pi_bar - b_h, w1, 2.0 * b_h, w2,
                   pi_bar + b_h]).astype(jnp.float32)

    grid = (s_pad // s_tile,)   # batch chunks: 'parallel' -> megacore on v7x

    out = pl.pallas_call(
        functools.partial(_wealth_rnn_kernel, seq_len=T,
                          approx_recip=approx_recip),
        out_shape=jax.ShapeDtypeStruct((T, s_pad, _LANE), jnp.float32),
        grid_spec=pltpu.PrefetchScalarGridSpec(
            num_scalar_prefetch=1,          # params -> SMEM
            grid=grid,
            in_specs=[
                pl.BlockSpec((T, s_tile, _LANE), lambda j, p: (0, j, 0)),
                pl.BlockSpec((T - 1, s_tile, _LANE), lambda j, p: (0, j, 0)),
            ],
            out_specs=pl.BlockSpec((T, s_tile, _LANE), lambda j, p: (0, j, 0)),
        ),
        compiler_params=pltpu.CompilerParams(
            dimension_semantics=("parallel",)),
    )(p, x2, r2)

    out = out.reshape(T, b_pad)[:, :B].reshape(T, B, H)
    hidden = out[-1:]           # (1, B, 1) == (n_layers, B, H) final state
    # TODO(synk): WealthRNN.forward's output2 = prod(FOA.cal_return(...) + 1, 0)
    # depends on FOA.cal_return, an undefined external dependency; not implemented.
    return out, hidden


def wealth_rnn_reference(inputs, target, returns, params):
    """Pure-JAX reference mirroring the PyTorch loop, for correctness check."""
    T, B, I = inputs.shape
    H = 1
    myret = returns.reshape(T - 1, B, H).astype(jnp.float32)
    w_in, w_h, b_h = params["w_in"], params["w_h"], params["b_h"]
    w1, w2, pi_bar = params["w1"], params["w2"], target

    def recurrence(x, h):
        ingate = x * w_in + w_h * h - (pi_bar - b_h)
        ingate2 = w1 * jnp.maximum(ingate, 0.0) + 2.0 * b_h
        return w2 * jnp.maximum(ingate2, 0.0) + pi_bar + b_h

    h = jnp.broadcast_to(inputs[0].astype(jnp.float32), (B, H))
    outs = [h]
    for i in range(1, T):
        h_adj = h * (1.0 + myret[i - 1]) / (1.0 + h * myret[i - 1])
        h = recurrence(inputs[i].astype(jnp.float32), h_adj)
        outs.append(h)
    return jnp.stack(outs, 0)


if __name__ == "__main__":
    # small shapes consistent with the module: seq=8, batch=8, hidden=input=1
    T, B, I, H = 8, 8, 1, 1

    key = jax.random.PRNGKey(0)
    k1, k2 = jax.random.split(key)
    inputs = jax.random.uniform(k1, (T, B, I), jnp.float32, 0.1, 0.9)
    returns = 0.05 * jax.random.normal(k2, (T - 1, B, H), jnp.float32)
    target = 0.5
    cost = 0.001  # unused (only consumed by the undefined FOA.cal_return)

    # deterministic parameters exactly as set in WealthRNN.__init__
    params = dict(w_in=0.0, w_h=1.0, b_h=0.0, w1=-1.0, w2=-1.0)

    ref = wealth_rnn_reference(inputs, jnp.float32(target), returns, params)

    # exact-divide path (bit-faithful to the PyTorch math)
    out, hidden = wealth_rnn_forward(inputs, target, returns, params,
                                     approx_recip=False)
    jax.block_until_ready((out, hidden))
    assert out.shape == (T, B, H) and hidden.shape == (1, B, H)
    assert jnp.allclose(out, ref, atol=1e-6, rtol=1e-6), "mismatch vs reference"

    # EUP approximate-reciprocal path (perf option), looser tolerance
    out_a, _ = wealth_rnn_forward(inputs, target, returns, params,
                                  approx_recip=True)
    jax.block_until_ready(out_a)
    assert jnp.allclose(out_a, ref, atol=1e-2, rtol=1e-2), "approx-recip mismatch"

    print("KERNEL_OK")
</pallas_src>

<mosaic_0001>
module attributes {stable_mosaic.version = 11 : i64} {
  func.func @_wealth_rnn_kernel(%arg0: i32, %arg1: memref<7xf32, #tpu.memory_space<smem>>, %arg2: memref<8x1x128xf32, #tpu.memory_space<vmem>>, %arg3: memref<7x1x128xf32, #tpu.memory_space<vmem>>, %arg4: memref<8x1x128xf32, #tpu.memory_space<vmem>>) attributes {dimension_semantics = [#tpu.dimension_semantics<parallel>], iteration_bounds = array<i64: 1>, scalar_prefetch = 1 : i64, scratch_operands = 0 : i64, tpu.core_type = #tpu.core_type<tc>, window_params = [{transform_indices = @transform_0, window_bounds = array<i64: 8, 1, 128>}, {transform_indices = @transform_1, window_bounds = array<i64: 7, 1, 128>}, {transform_indices = @transform_2, window_bounds = array<i64: 8, 1, 128>}]} {
    %c0 = arith.constant 0 : index
    %0 = memref.load %arg1[%c0] : memref<7xf32, #tpu.memory_space<smem>>
    %c1 = arith.constant 1 : index
    %1 = memref.load %arg1[%c1] : memref<7xf32, #tpu.memory_space<smem>>
    %c2 = arith.constant 2 : index
    %2 = memref.load %arg1[%c2] : memref<7xf32, #tpu.memory_space<smem>>
    %c3 = arith.constant 3 : index
    %3 = memref.load %arg1[%c3] : memref<7xf32, #tpu.memory_space<smem>>
    %c4 = arith.constant 4 : index
    %4 = memref.load %arg1[%c4] : memref<7xf32, #tpu.memory_space<smem>>
    %c5 = arith.constant 5 : index
    %5 = memref.load %arg1[%c5] : memref<7xf32, #tpu.memory_space<smem>>
    %c6 = arith.constant 6 : index
    %6 = memref.load %arg1[%c6] : memref<7xf32, #tpu.memory_space<smem>>
    %c0_0 = arith.constant 0 : index
    %c0_1 = arith.constant 0 : index
    %c0_2 = arith.constant 0 : index
    %7 = vector.load %arg2[%c0_0, %c0_1, %c0_2] : memref<8x1x128xf32, #tpu.memory_space<vmem>>, vector<1x1x128xf32>
    %8 = vector.shape_cast %7 : vector<1x1x128xf32> to vector<1x128xf32>
    %c0_3 = arith.constant 0 : index
    %c0_4 = arith.constant 0 : index
    %c0_5 = arith.constant 0 : index
    %9 = vector.load %arg4[%c0_3, %c0_4, %c0_5] : memref<8x1x128xf32, #tpu.memory_space<vmem>>, vector<1x1x128xf32>
    %10 = vector.shape_cast %9 : vector<1x1x128xf32> to vector<1x128xf32>
    %11 = vector.shape_cast %8 : vector<1x128xf32> to vector<1x1x128xf32>
    tpu.vector_store %arg4[%c0_3, %c0_4, %c0_5], %11 {strides = array<i32>} : memref<8x1x128xf32, #tpu.memory_space<vmem>>, vector<1x1x128xf32>,
    %c1_6 = arith.constant 1 : index
    %c0_7 = arith.constant 0 : index
    %c0_8 = arith.constant 0 : index
    %12 = vector.load %arg2[%c1_6, %c0_7, %c0_8] : memref<8x1x128xf32, #tpu.memory_space<vmem>>, vector<1x1x128xf32>
    %13 = vector.shape_cast %12 : vector<1x1x128xf32> to vector<1x128xf32>
    %c0_9 = arith.constant 0 : index
    %c0_10 = arith.constant 0 : index
    %c0_11 = arith.constant 0 : index
    %14 = vector.load %arg3[%c0_9, %c0_10, %c0_11] : memref<7x1x128xf32, #tpu.memory_space<vmem>>, vector<1x1x128xf32>
    %15 = vector.shape_cast %14 : vector<1x1x128xf32> to vector<1x128xf32>
    %cst = arith.constant 1.000000e+00 : f32
    %16 = vector.broadcast %cst : f32 to vector<1x128xf32>
    %17 = arith.addf %16, %15 : vector<1x128xf32>
    %18 = arith.mulf %8, %17 : vector<1x128xf32>
    %19 = arith.mulf %8, %15 : vector<1x128xf32>
    %cst_12 = arith.constant 1.000000e+00 : f32
    %20 = vector.broadcast %cst_12 : f32 to vector<1x128xf32>
    %21 = arith.addf %20, %19 : vector<1x128xf32>
    %22 = arith.divf %18, %21 : vector<1x128xf32>
    %23 = vector.broadcast %0 : f32 to vector<1x128xf32>
    %24 = arith.mulf %13, %23 : vector<1x128xf32>
    %25 = vector.broadcast %1 : f32 to vector<1x128xf32>
    %26 = arith.mulf %25, %22 : vector<1x128xf32>
    %27 = arith.addf %24, %26 : vector<1x128xf32>
    %28 = vector.broadcast %2 : f32 to vector<1x128xf32>
    %29 = arith.subf %27, %28 : vector<1x128xf32>
    %cst_13 = arith.constant 0.000000e+00 : f32
    %30 = vector.broadcast %cst_13 : f32 to vector<1x128xf32>
    %31 = arith.maximumf %29, %30 : vector<1x128xf32>
    %32 = vector.broadcast %3 : f32 to vector<1x128xf32>
    %33 = arith.mulf %32, %31 : vector<1x128xf32>
    %34 = vector.broadcast %4 : f32 to vector<1x128xf32>
    %35 = arith.addf %33, %34 : vector<1x128xf32>
    %cst_14 = arith.constant 0.000000e+00 : f32
    %36 = vector.broadcast %cst_14 : f32 to vector<1x128xf32>
    %37 = arith.maximumf %35, %36 : vector<1x128xf32>
    %38 = vector.broadcast %5 : f32 to vector<1x128xf32>
    %39 = arith.mulf %38, %37 : vector<1x128xf32>
    %40 = vector.broadcast %6 : f32 to vector<1x128xf32>
    %41 = arith.addf %39, %40 : vector<1x128xf32>
    %c1_15 = arith.constant 1 : index
    %c0_16 = arith.constant 0 : index
    %c0_17 = arith.constant 0 : index
    %42 = vector.load %arg4[%c1_15, %c0_16, %c0_17] : memref<8x1x128xf32, #tpu.memory_space<vmem>>, vector<1x1x128xf32>
    %43 = vector.shape_cast %42 : vector<1x1x128xf32> to vector<1x128xf32>
    %44 = vector.shape_cast %41 : vector<1x128xf32> to vector<1x1x128xf32>
    tpu.vector_store %arg4[%c1_15, %c0_16, %c0_17], %44 {strides = array<i32>} : memref<8x1x128xf32, #tpu.memory_space<vmem>>, vector<1x1x128xf32>,
    %c2_18 = arith.constant 2 : index
    %c0_19 = arith.constant 0 : index
    %c0_20 = arith.constant 0 : index
    %45 = vector.load %arg2[%c2_18, %c0_19, %c0_20] : memref<8x1x128xf32, #tpu.memory_space<vmem>>, vector<1x1x128xf32>
    %46 = vector.shape_cast %45 : vector<1x1x128xf32> to vector<1x128xf32>
    %c1_21 = arith.constant 1 : index
    %c0_22 = arith.constant 0 : index
    %c0_23 = arith.constant 0 : index
    %47 = vector.load %arg3[%c1_21, %c0_22, %c0_23] : memref<7x1x128xf32, #tpu.memory_space<vmem>>, vector<1x1x128xf32>
    %48 = vector.shape_cast %47 : vector<1x1x128xf32> to vector<1x128xf32>
    %cst_24 = arith.constant 1.000000e+00 : f32
    %49 = vector.broadcast %cst_24 : f32 to vector<1x128xf32>
    %50 = arith.addf %49, %48 : vector<1x128xf32>
    %51 = arith.mulf %41, %50 : vector<1x128xf32>
    %52 = arith.mulf %41, %48 : vector<1x128xf32>
    %cst_25 = arith.constant 1.000000e+00 : f32
    %53 = vector.broadcast %cst_25 : f32 to vector<1x128xf32>
    %54 = arith.addf %53, %52 : vector<1x128xf32>
    %55 = arith.divf %51, %54 : vector<1x128xf32>
    %56 = vector.broadcast %0 : f32 to vector<1x128xf32>
    %57 = arith.mulf %46, %56 : vector<1x128xf32>
    %58 = vector.broadcast %1 : f32 to vector<1x128xf32>
    %59 = arith.mulf %58, %55 : vector<1x128xf32>
    %60 = arith.addf %57, %59 : vector<1x128xf32>
    %61 = vector.broadcast %2 : f32 to vector<1x128xf32>
    %62 = arith.subf %60, %61 : vector<1x128xf32>
    %cst_26 = arith.constant 0.000000e+00 : f32
    %63 = vector.broadcast %cst_26 : f32 to vector<1x128xf32>
    %64 = arith.maximumf %62, %63 : vector<1x128xf32>
    %65 = vector.broadcast %3 : f32 to vector<1x128xf32>
    %66 = arith.mulf %65, %64 : vector<1x128xf32>
    %67 = vector.broadcast %4 : f32 to vector<1x128xf32>
    %68 = arith.addf %66, %67 : vector<1x128xf32>
    %cst_27 = arith.constant 0.000000e+00 : f32
    %69 = vector.broadcast %cst_27 : f32 to vector<1x128xf32>
    %70 = arith.maximumf %68, %69 : vector<1x128xf32>
    %71 = vector.broadcast %5 : f32 to vector<1x128xf32>
    %72 = arith.mulf %71, %70 : vector<1x128xf32>
    %73 = vector.broadcast %6 : f32 to vector<1x128xf32>
    %74 = arith.addf %72, %73 : vector<1x128xf32>
    %c2_28 = arith.constant 2 : index
    %c0_29 = arith.constant 0 : index
    %c0_30 = arith.constant 0 : index
    %75 = vector.load %arg4[%c2_28, %c0_29, %c0_30] : memref<8x1x128xf32, #tpu.memory_space<vmem>>, vector<1x1x128xf32>
    %76 = vector.shape_cast %75 : vector<1x1x128xf32> to vector<1x128xf32>
    %77 = vector.shape_cast %74 : vector<1x128xf32> to vector<1x1x128xf32>
    tpu.vector_store %arg4[%c2_28, %c0_29, %c0_30], %77 {strides = array<i32>} : memref<8x1x128xf32, #tpu.memory_space<vmem>>, vector<1x1x128xf32>,
    %c3_31 = arith.constant 3 : index
    %c0_32 = arith.constant 0 : index
    %c0_33 = arith.constant 0 : index
    %78 = vector.load %arg2[%c3_31, %c0_32, %c0_33] : memref<8x1x128xf32, #tpu.memory_space<vmem>>, vector<1x1x128xf32>
    %79 = vector.shape_cast %78 : vector<1x1x128xf32> to vector<1x128xf32>
    %c2_34 = arith.constant 2 : index
    %c0_35 = arith.constant 0 : index
    %c0_36 = arith.constant 0 : index
    %80 = vector.load %arg3[%c2_34, %c0_35, %c0_36] : memref<7x1x128xf32, #tpu.memory_space<vmem>>, vector<1x1x128xf32>
    %81 = vector.shape_cast %80 : vector<1x1x128xf32> to vector<1x128xf32>
    %cst_37 = arith.constant 1.000000e+00 : f32
    %82 = vector.broadcast %cst_37 : f32 to vector<1x128xf32>
    %83 = arith.addf %82, %81 : vector<1x128xf32>
    %84 = arith.mulf %74, %83 : vector<1x128xf32>
    %85 = arith.mulf %74, %81 : vector<1x128xf32>
    %cst_38 = arith.constant 1.000000e+00 : f32
    %86 = vector.broadcast %cst_38 : f32 to vector<1x128xf32>
    %87 = arith.addf %86, %85 : vector<1x128xf32>
    %88 = arith.divf %84, %87 : vector<1x128xf32>
    %89 = vector.broadcast %0 : f32 to vector<1x128xf32>
    %90 = arith.mulf %79, %89 : vector<1x128xf32>
    %91 = vector.broadcast %1 : f32 to vector<1x128xf32>
    %92 = arith.mulf %91, %88 : vector<1x128xf32>
    %93 = arith.addf %90, %92 : vector<1x128xf32>
    %94 = vector.broadcast %2 : f32 to vector<1x128xf32>
    %95 = arith.subf %93, %94 : vector<1x128xf32>
    %cst_39 = arith.constant 0.000000e+00 : f32
    %96 = vector.broadcast %cst_39 : f32 to vector<1x128xf32>
    %97 = arith.maximumf %95, %96 : vector<1x128xf32>
    %98 = vector.broadcast %3 : f32 to vector<1x128xf32>
    %99 = arith.mulf %98, %97 : vector<1x128xf32>
    %100 = vector.broadcast %4 : f32 to vector<1x128xf32>
    %101 = arith.addf %99, %100 : vector<1x128xf32>
    %cst_40 = arith.constant 0.000000e+00 : f32
    %102 = vector.broadcast %cst_40 : f32 to vector<1x128xf32>
    %103 = arith.maximumf %101, %102 : vector<1x128xf32>
    %104 = vector.broadcast %5 : f32 to vector<1x128xf32>
    %105 = arith.mulf %104, %103 : vector<1x128xf32>
    %106 = vector.broadcast %6 : f32 to vector<1x128xf32>
    %107 = arith.addf %105, %106 : vector<1x128xf32>
    %c3_41 = arith.constant 3 : index
    %c0_42 = arith.constant 0 : index
    %c0_43 = arith.constant 0 : index
    %108 = vector.load %arg4[%c3_41, %c0_42, %c0_43] : memref<8x1x128xf32, #tpu.memory_space<vmem>>, vector<1x1x128xf32>
    %109 = vector.shape_cast %108 : vector<1x1x128xf32> to vector<1x128xf32>
    %110 = vector.shape_cast %107 : vector<1x128xf32> to vector<1x1x128xf32>
    tpu.vector_store %arg4[%c3_41, %c0_42, %c0_43], %110 {strides = array<i32>} : memref<8x1x128xf32, #tpu.memory_space<vmem>>, vector<1x1x128xf32>,
    %c4_44 = arith.constant 4 : index
    %c0_45 = arith.constant 0 : index
    %c0_46 = arith.constant 0 : index
    %111 = vector.load %arg2[%c4_44, %c0_45, %c0_46] : memref<8x1x128xf32, #tpu.memory_space<vmem>>, vector<1x1x128xf32>
    %112 = vector.shape_cast %111 : vector<1x1x128xf32> to vector<1x128xf32>
    %c3_47 = arith.constant 3 : index
    %c0_48 = arith.constant 0 : index
    %c0_49 = arith.constant 0 : index
    %113 = vector.load %arg3[%c3_47, %c0_48, %c0_49] : memref<7x1x128xf32, #tpu.memory_space<vmem>>, vector<1x1x128xf32>
    %114 = vector.shape_cast %113 : vector<1x1x128xf32> to vector<1x128xf32>
    %cst_50 = arith.constant 1.000000e+00 : f32
    %115 = vector.broadcast %cst_50 : f32 to vector<1x128xf32>
    %116 = arith.addf %115, %114 : vector<1x128xf32>
    %117 = arith.mulf %107, %116 : vector<1x128xf32>
    %118 = arith.mulf %107, %114 : vector<1x128xf32>
    %cst_51 = arith.constant 1.000000e+00 : f32
    %119 = vector.broadcast %cst_51 : f32 to vector<1x128xf32>
    %120 = arith.addf %119, %118 : vector<1x128xf32>
    %121 = arith.divf %117, %120 : vector<1x128xf32>
    %122 = vector.broadcast %0 : f32 to vector<1x128xf32>
    %123 = arith.mulf %112, %122 : vector<1x128xf32>
    %124 = vector.broadcast %1 : f32 to vector<1x128xf32>
    %125 = arith.mulf %124, %121 : vector<1x128xf32>
    %126 = arith.addf %123, %125 : vector<1x128xf32>
    %127 = vector.broadcast %2 : f32 to vector<1x128xf32>
    %128 = arith.subf %126, %127 : vector<1x128xf32>
    %cst_52 = arith.constant 0.000000e+00 : f32
    %129 = vector.broadcast %cst_52 : f32 to vector<1x128xf32>
    %130 = arith.maximumf %128, %129 : vector<1x128xf32>
    %131 = vector.broadcast %3 : f32 to vector<1x128xf32>
    %132 = arith.mulf %131, %130 : vector<1x128xf32>
    %133 = vector.broadcast %4 : f32 to vector<1x128xf32>
    %134 = arith.addf %132, %133 : vector<1x128xf32>
    %cst_53 = arith.constant 0.000000e+00 : f32
    %135 = vector.broadcast %cst_53 : f32 to vector<1x128xf32>
    %136 = arith.maximumf %134, %135 : vector<1x128xf32>
    %137 = vector.broadcast %5 : f32 to vector<1x128xf32>
    %138 = arith.mulf %137, %136 : vector<1x128xf32>
    %139 = vector.broadcast %6 : f32 to vector<1x128xf32>
    %140 = arith.addf %138, %139 : vector<1x128xf32>
    %c4_54 = arith.constant 4 : index
    %c0_55 = arith.constant 0 : index
    %c0_56 = arith.constant 0 : index
    %141 = vector.load %arg4[%c4_54, %c0_55, %c0_56] : memref<8x1x128xf32, #tpu.memory_space<vmem>>, vector<1x1x128xf32>
    %142 = vector.shape_cast %141 : vector<1x1x128xf32> to vector<1x128xf32>
    %143 = vector.shape_cast %140 : vector<1x128xf32> to vector<1x1x128xf32>
    tpu.vector_store %arg4[%c4_54, %c0_55, %c0_56], %143 {strides = array<i32>} : memref<8x1x128xf32, #tpu.memory_space<vmem>>, vector<1x1x128xf32>,
    %c5_57 = arith.constant 5 : index
    %c0_58 = arith.constant 0 : index
    %c0_59 = arith.constant 0 : index
    %144 = vector.load %arg2[%c5_57, %c0_58, %c0_59] : memref<8x1x128xf32, #tpu.memory_space<vmem>>, vector<1x1x128xf32>
    %145 = vector.shape_cast %144 : vector<1x1x128xf32> to vector<1x128xf32>
    %c4_60 = arith.constant 4 : index
    %c0_61 = arith.constant 0 : index
    %c0_62 = arith.constant 0 : index
    %146 = vector.load %arg3[%c4_60, %c0_61, %c0_62] : memref<7x1x128xf32, #tpu.memory_space<vmem>>, vector<1x1x128xf32>
    %147 = vector.shape_cast %146 : vector<1x1x128xf32> to vector<1x128xf32>
    %cst_63 = arith.constant 1.000000e+00 : f32
    %148 = vector.broadcast %cst_63 : f32 to vector<1x128xf32>
    %149 = arith.addf %148, %147 : vector<1x128xf32>
    %150 = arith.mulf %140, %149 : vector<1x128xf32>
    %151 = arith.mulf %140, %147 : vector<1x128xf32>
    %cst_64 = arith.constant 1.000000e+00 : f32
    %152 = vector.broadcast %cst_64 : f32 to vector<1x128xf32>
    %153 = arith.addf %152, %151 : vector<1x128xf32>
    %154 = arith.divf %150, %153 : vector<1x128xf32>
    %155 = vector.broadcast %0 : f32 to vector<1x128xf32>
    %156 = arith.mulf %145, %155 : vector<1x128xf32>
    %157 = vector.broadcast %1 : f32 to vector<1x128xf32>
    %158 = arith.mulf %157, %154 : vector<1x128xf32>
    %159 = arith.addf %156, %158 : vector<1x128xf32>
    %160 = vector.broadcast %2 : f32 to vector<1x128xf32>
    %161 = arith.subf %159, %160 : vector<1x128xf32>
    %cst_65 = arith.constant 0.000000e+00 : f32
    %162 = vector.broadcast %cst_65 : f32 to vector<1x128xf32>
    %163 = arith.maximumf %161, %162 : vector<1x128xf32>
    %164 = vector.broadcast %3 : f32 to vector<1x128xf32>
    %165 = arith.mulf %164, %163 : vector<1x128xf32>
    %166 = vector.broadcast %4 : f32 to vector<1x128xf32>
    %167 = arith.addf %165, %166 : vector<1x128xf32>
    %cst_66 = arith.constant 0.000000e+00 : f32
    %168 = vector.broadcast %cst_66 : f32 to vector<1x128xf32>
    %169 = arith.maximumf %167, %168 : vector<1x128xf32>
    %170 = vector.broadcast %5 : f32 to vector<1x128xf32>
    %171 = arith.mulf %170, %169 : vector<1x128xf32>
    %172 = vector.broadcast %6 : f32 to vector<1x128xf32>
    %173 = arith.addf %171, %172 : vector<1x128xf32>
    %c5_67 = arith.constant 5 : index
    %c0_68 = arith.constant 0 : index
    %c0_69 = arith.constant 0 : index
    %174 = vector.load %arg4[%c5_67, %c0_68, %c0_69] : memref<8x1x128xf32, #tpu.memory_space<vmem>>, vector<1x1x128xf32>
    %175 = vector.shape_cast %174 : vector<1x1x128xf32> to vector<1x128xf32>
    %176 = vector.shape_cast %173 : vector<1x128xf32> to vector<1x1x128xf32>
    tpu.vector_store %arg4[%c5_67, %c0_68, %c0_69], %176 {strides = array<i32>} : memref<8x1x128xf32, #tpu.memory_space<vmem>>, vector<1x1x128xf32>,
    %c6_70 = arith.constant 6 : index
    %c0_71 = arith.constant 0 : index
    %c0_72 = arith.constant 0 : index
    %177 = vector.load %arg2[%c6_70, %c0_71, %c0_72] : memref<8x1x128xf32, #tpu.memory_space<vmem>>, vector<1x1x128xf32>
    %178 = vector.shape_cast %177 : vector<1x1x128xf32> to vector<1x128xf32>
    %c5_73 = arith.constant 5 : index
    %c0_74 = arith.constant 0 : index
    %c0_75 = arith.constant 0 : index
    %179 = vector.load %arg3[%c5_73, %c0_74, %c0_75] : memref<7x1x128xf32, #tpu.memory_space<vmem>>, vector<1x1x128xf32>
    %180 = vector.shape_cast %179 : vector<1x1x128xf32> to vector<1x128xf32>
    %cst_76 = arith.constant 1.000000e+00 : f32
    %181 = vector.broadcast %cst_76 : f32 to vector<1x128xf32>
    %182 = arith.addf %181, %180 : vector<1x128xf32>
    %183 = arith.mulf %173, %182 : vector<1x128xf32>
    %184 = arith.mulf %173, %180 : vector<1x128xf32>
    %cst_77 = arith.constant 1.000000e+00 : f32
    %185 = vector.broadcast %cst_77 : f32 to vector<1x128xf32>
    %186 = arith.addf %185, %184 : vector<1x128xf32>
    %187 = arith.divf %183, %186 : vector<1x128xf32>
    %188 = vector.broadcast %0 : f32 to vector<1x128xf32>
    %189 = arith.mulf %178, %188 : vector<1x128xf32>
    %190 = vector.broadcast %1 : f32 to vector<1x128xf32>
    %191 = arith.mulf %190, %187 : vector<1x128xf32>
    %192 = arith.addf %189, %191 : vector<1x128xf32>
    %193 = vector.broadcast %2 : f32 to vector<1x128xf32>
    %194 = arith.subf %192, %193 : vector<1x128xf32>
    %cst_78 = arith.constant 0.000000e+00 : f32
    %195 = vector.broadcast %cst_78 : f32 to vector<1x128xf32>
    %196 = arith.maximumf %194, %195 : vector<1x128xf32>
    %197 = vector.broadcast %3 : f32 to vector<1x128xf32>
    %198 = arith.mulf %197, %196 : vector<1x128xf32>
    %199 = vector.broadcast %4 : f32 to vector<1x128xf32>
    %200 = arith.addf %198, %199 : vector<1x128xf32>
    %cst_79 = arith.constant 0.000000e+00 : f32
    %201 = vector.broadcast %cst_79 : f32 to vector<1x128xf32>
    %202 = arith.maximumf %200, %201 : vector<1x128xf32>
    %203 = vector.broadcast %5 : f32 to vector<1x128xf32>
    %204 = arith.mulf %203, %202 : vector<1x128xf32>
    %205 = vector.broadcast %6 : f32 to vector<1x128xf32>
    %206 = arith.addf %204, %205 : vector<1x128xf32>
    %c6_80 = arith.constant 6 : index
    %c0_81 = arith.constant 0 : index
    %c0_82 = arith.constant 0 : index
    %207 = vector.load %arg4[%c6_80, %c0_81, %c0_82] : memref<8x1x128xf32, #tpu.memory_space<vmem>>, vector<1x1x128xf32>
    %208 = vector.shape_cast %207 : vector<1x1x128xf32> to vector<1x128xf32>
    %209 = vector.shape_cast %206 : vector<1x128xf32> to vector<1x1x128xf32>
    tpu.vector_store %arg4[%c6_80, %c0_81, %c0_82], %209 {strides = array<i32>} : memref<8x1x128xf32, #tpu.memory_space<vmem>>, vector<1x1x128xf32>,
    %c7 = arith.constant 7 : index
    %c0_83 = arith.constant 0 : index
    %c0_84 = arith.constant 0 : index
    %210 = vector.load %arg2[%c7, %c0_83, %c0_84] : memref<8x1x128xf32, #tpu.memory_space<vmem>>, vector<1x1x128xf32>
    %211 = vector.shape_cast %210 : vector<1x1x128xf32> to vector<1x128xf32>
    %c6_85 = arith.constant 6 : index
    %c0_86 = arith.constant 0 : index
    %c0_87 = arith.constant 0 : index
    %212 = vector.load %arg3[%c6_85, %c0_86, %c0_87] : memref<7x1x128xf32, #tpu.memory_space<vmem>>, vector<1x1x128xf32>
    %213 = vector.shape_cast %212 : vector<1x1x128xf32> to vector<1x128xf32>
    %cst_88 = arith.constant 1.000000e+00 : f32
    %214 = vector.broadcast %cst_88 : f32 to vector<1x128xf32>
    %215 = arith.addf %214, %213 : vector<1x128xf32>
    %216 = arith.mulf %206, %215 : vector<1x128xf32>
    %217 = arith.mulf %206, %213 : vector<1x128xf32>
    %cst_89 = arith.constant 1.000000e+00 : f32
    %218 = vector.broadcast %cst_89 : f32 to vector<1x128xf32>
    %219 = arith.addf %218, %217 : vector<1x128xf32>
    %220 = arith.divf %216, %219 : vector<1x128xf32>
    %221 = vector.broadcast %0 : f32 to vector<1x128xf32>
    %222 = arith.mulf %211, %221 : vector<1x128xf32>
    %223 = vector.broadcast %1 : f32 to vector<1x128xf32>
    %224 = arith.mulf %223, %220 : vector<1x128xf32>
    %225 = arith.addf %222, %224 : vector<1x128xf32>
    %226 = vector.broadcast %2 : f32 to vector<1x128xf32>
    %227 = arith.subf %225, %226 : vector<1x128xf32>
    %cst_90 = arith.constant 0.000000e+00 : f32
    %228 = vector.broadcast %cst_90 : f32 to vector<1x128xf32>
    %229 = arith.maximumf %227, %228 : vector<1x128xf32>
    %230 = vector.broadcast %3 : f32 to vector<1x128xf32>
    %231 = arith.mulf %230, %229 : vector<1x128xf32>
    %232 = vector.broadcast %4 : f32 to vector<1x128xf32>
    %233 = arith.addf %231, %232 : vector<1x128xf32>
    %cst_91 = arith.constant 0.000000e+00 : f32
    %234 = vector.broadcast %cst_91 : f32 to vector<1x128xf32>
    %235 = arith.maximumf %233, %234 : vector<1x128xf32>
    %236 = vector.broadcast %5 : f32 to vector<1x128xf32>
    %237 = arith.mulf %236, %235 : vector<1x128xf32>
    %238 = vector.broadcast %6 : f32 to vector<1x128xf32>
    %239 = arith.addf %237, %238 : vector<1x128xf32>
    %c7_92 = arith.constant 7 : index
    %c0_93 = arith.constant 0 : index
    %c0_94 = arith.constant 0 : index
    %240 = vector.load %arg4[%c7_92, %c0_93, %c0_94] : memref<8x1x128xf32, #tpu.memory_space<vmem>>, vector<1x1x128xf32>
    %241 = vector.shape_cast %240 : vector<1x1x128xf32> to vector<1x128xf32>
    %242 = vector.shape_cast %239 : vector<1x128xf32> to vector<1x1x128xf32>
    tpu.vector_store %arg4[%c7_92, %c0_93, %c0_94], %242 {strides = array<i32>} : memref<8x1x128xf32, #tpu.memory_space<vmem>>, vector<1x1x128xf32>,
    return
  }
  func.func @transform_0(%arg0: i32, %arg1: memref<7xf32, #tpu.memory_space<smem>>) -> (i32, i32, i32) {
    %c0_i32 = arith.constant 0 : i32
    %c0_i32_0 = arith.constant 0 : i32
    %c0_i32_1 = arith.constant 0 : i32
    return %c0_i32, %arg0, %c0_i32_0 : i32, i32, i32
  }
  func.func @transform_1(%arg0: i32, %arg1: memref<7xf32, #tpu.memory_space<smem>>) -> (i32, i32, i32) {
    %c0_i32 = arith.constant 0 : i32
    %c0_i32_0 = arith.constant 0 : i32
    %c0_i32_1 = arith.constant 0 : i32
    return %c0_i32, %arg0, %c0_i32_0 : i32, i32, i32
  }
  func.func @transform_2(%arg0: i32, %arg1: memref<7xf32, #tpu.memory_space<smem>>) -> (i32, i32, i32) {
    %c0_i32 = arith.constant 0 : i32
    %c0_i32_0 = arith.constant 0 : i32
    %c0_i32_1 = arith.constant 0 : i32
    return %c0_i32, %arg0, %c0_i32_0 : i32, i32, i32
  }
}

</mosaic_0001>

<bundles_post_ra>
// kernel: tpu_custom_call.1
= control target key start
LH: loop header
LB: loop body
LE: loop exit
PB: predicated region body
PF: predicated region fallthrough
CT: control target
= control target key end

     0   :  { %s334_s12 = smov [#allocation3]   ;;  %s444_s0 = inlined_call_operand.hbm [shape: f32[7], index: 0, kind: input, shape index: {}]   ;;  %s445_s1 = inlined_call_operand.hbm [shape: f32[8,1,128], index: 1, kind: input, shape index: {}]   ;;  %s446_s2 = inlined_call_operand.hbm [shape: f32[7,1,128], index: 2, kind: input, shape index: {}]   ;;  %s447_s3 = inlined_call_operand.hbm [shape: f32[8,1,128], index: 3, kind: output, shape index: {}]  }
   0x1   :  { %9 = dma.hbm_to_smem %s444_s0, 16, %s334_s12, [#allocation2] }
   0x2   :  { %326 = dma.done.wait [#allocation2], 16 }
   0x3   :  { %327 = vsyncadd [#allocation2], 4294967280 }
   0x4   :  { %11 = sfence }
   0x5   :  { %12 = vsyncpa [#allocation5], 0 }
   0x6   :  { %13 = vsyncpa [#allocation8], 0 }
   0x7   :  { %14 = vsyncpa [#allocation6], 0  ;;  %s335_s15 = smov [#allocation4]  }
   0x8   :  { %s20_s16 = sshll.u32 %s335_s15, 4  ;;  %s21_s16 = int_to_ptr.vmem [resolvable:$true] %s20_s16 }
   0x9   :  { %s274_s17 = scalar_lea.vmem %s21_s16, 128  ;;  %p279_p1 = scmp.lt.s32.totalorder %s21_s16, %s21_s16 }
   0xa   :  { %p275_p0 = scmp.ne.s32.totalorder %s21_s16, %s274_s17  ;;  %p280_p2 = scmp.lt.s32.totalorder %s274_s17, %s274_s17 }
   0xc   :  { %p281_p3 = por %p280_p2, %p279_p1 }
   0xe   :  { %p282_p4 = pnand %p281_p3, %p275_p0 }
  0x10   :  { %285 = shalt.err (!%p282_p4)
}
  0x11   :  { %s336_s18 = smov 16   ;;  %s337_s19 = smov 1  }
  0x12   :  { %26 = dma.hbm_to_vmem [thread:$0]  %s445_s1, 128, %s21_s16, [#allocation5], %s336_s18, %s336_s18, %s337_s19  }
  0x13   :  { %s338_s21 = smov [#allocation7]  }
  0x14   :  { %s32_s22 = sshll.u32 %s338_s21, 4  ;;  %s33_s22 = int_to_ptr.vmem [resolvable:$true] %s32_s22 }
  0x15   :  { %s294_s23 = scalar_lea.vmem %s33_s22, 112  ;;  %s298_s24 = scalar_lea.vmem %s33_s22, 128 }
  0x16   :  { %p295_p5 = scmp.ne.s32.totalorder %s33_s22, %s294_s23  ;;  %p299_p6 = scmp.lt.s32.totalorder %s33_s22, %s33_s22 }
  0x17   :  { %p300_p7 = scmp.lt.s32.totalorder %s298_s24, %s294_s23 }
  0x19   :  { %p301_p8 = por %p300_p7, %p299_p6 }
  0x1b   :  { %p302_p9 = pnand %p301_p8, %p295_p5 }
  0x1d   :  { %305 = shalt.err (!%p302_p9)
}
  0x1e   :  { %38 = dma.hbm_to_vmem [thread:$0]  %s446_s2, 112, %s33_s22, [#allocation8], %s336_s18, %s336_s18, %s337_s19  }
  0x1f   :  { %328 = dma.done.wait [#allocation5], 128  }
  0x20   :  { %329 = vsyncadd [#allocation5], 4294967168 }
  0x21   :  { %330 = dma.done.wait [#allocation8], 112  }
  0x22   :  { %331 = vsyncadd [#allocation8], 4294967184  ;;  %v52_v0 = vld [vmem:[#allocation4] sm:$0x1]  ;;  %v56_v1 = vld [vmem:[#allocation7] sm:$0x1] }
  0x23   :  { %53 = vst [vmem:[#allocation9] sm:$0x1] %v52_v0  ;;  %v59_v2 = vmul.f32 %v56_v1, %v52_v0  ;;  %s45_s1 = sld [smem:[#allocation3]]  ;;  %v57_v4 = vadd.f32 1.0, %v56_v1  ;;  %v55_v6 = vld [vmem:[#allocation4 + $0x1] sm:$0x1] }
  0x24   :  { %s232_s27 = sld [smem:[#allocation3 + $0x1]]  ;;  %v85_v25 = vld [vmem:[#allocation7 + $0x1] sm:$0x1]  ;;  %v83_v31 = vld [vmem:[#allocation4 + $0x2] sm:$0x1]  ;;  %s339_s5 = smov [#allocation9]  }
  0x25   :  { %v60_v3 = vadd.f32 1.0, %v59_v2  ;;  %s233_s28 = sld [smem:[#allocation3 + $0x2]]  ;;  %v58_v5 = vmul.f32 %v57_v4, %v52_v0  ;;  %v86_v29 = vadd.f32 1.0, %v85_v25  ;;  %v107_v43 = vld [vmem:[#allocation7 + $0x2] sm:$0x1]  ;;  %s219_s6 = sshll.u32 %s339_s5, 4  ;;  %s220_s6 = int_to_ptr.vmem [resolvable:$true] %s219_s6 }
  0x26   :  { %s234_s2 = sld [smem:[#allocation3 + $0x3]]  ;;  %v108_v47 = vadd.f32 1.0, %v107_v43  ;;  %v105_v49 = vld [vmem:[#allocation4 + $0x3] sm:$0x1]  ;;  %v129_v61 = vld [vmem:[#allocation7 + $0x3] sm:$0x1]  ;;  %p311_p11 = scmp.lt.s32.totalorder %s220_s6, %s220_s6 }
  0x27   :  { %244 = vrcp.f32 %v60_v3  ;;  %s235_s29 = sld [smem:[#allocation3 + $0x4]]  ;;  %v130_v1 = vadd.f32 1.0, %v129_v61  ;;  %v127_v3 = vld [vmem:[#allocation4 + $0x4] sm:$0x1]  ;;  %s306_s7 = scalar_lea.vmem %s220_s6, 128 }
  0x28   :  { %s236_s30 = sld [smem:[#allocation3 + $0x5]]  ;;  %p307_p10 = scmp.ne.s32.totalorder %s220_s6, %s306_s7 }
  0x29   :  { %v375_v7 = vstv %s45_s1  ;;  %s237_s4 = sld [smem:[#allocation3 + $0x6]]  ;;  %p312_p12 = scmp.lt.s32.totalorder %s306_s7, %s306_s7 }
  0x2a   :  { %v377_v9 = vstv %s232_s27  ;;  %v64_v11 = vmul.f32 %v375_v7, %v55_v6  ;;  %v92_v34 = vmul.f32 %v83_v31, %v375_v7  ;;  %v114_v52 = vmul.f32 %v105_v49, %v375_v7 }
  0x2b   :  { %v381_v13 = vstv %s233_s28  ;;  %v136_v6 = vmul.f32 %v127_v3, %v375_v7  ;;  %p313_p13 = por %p312_p12, %p311_p11 }
  0x2c   :  { %v384_v16 = vstv %s234_s2 }
  0x2d   :  { %v386_v18 = vstv %s235_s29  ;;  %p314_p0 = pnand %p313_p13, %p307_p10 }
  0x2e   :  { %v390_v21 = vstv %s236_s30 }
  0x2f   :  { %v392_v23 = vstv %s237_s4 }
  0x34   :  { %v245_v8 = vpop.eup %244 }
  0x35   :  { %v62_v10 = vmul.f32 %v245_v8, %v58_v5 }
  0x37   :  { %v66_v12 = vmul.f32 %v377_v9, %v62_v10 }
  0x39   :  { %v67_v14 = vadd.f32 %v66_v12, %v64_v11 }
  0x3b   :  { %v69_v15 = vsub.f32 %v67_v14, %v381_v13 }
  0x3d   :  { %v70_v17 = vmax.f32 %v69_v15, 0.0 }
  0x3f   :  { %v72_v19 = vmul.f32 %v384_v16, %v70_v17 }
  0x41   :  { %v74_v20 = vadd.f32 %v386_v18, %v72_v19 }
  0x43   :  { %v75_v22 = vmax.f32 %v74_v20, 0.0  ;;  %v151_v20 = vld [vmem:[#allocation7 + $0x4] sm:$0x1] }
  0x45   :  { %v77_v24 = vmul.f32 %v390_v21, %v75_v22 }
  0x47   :  { %v79_v26 = vadd.f32 %v392_v23, %v77_v24 }
  0x49   :  { %81 = vst [vmem:[#allocation9 + $0x1] sm:$0x1] %v79_v26  ;;  %v88_v27 = vmul.f32 %v85_v25, %v79_v26  ;;  %v87_v30 = vmul.f32 %v86_v29, %v79_v26  ;;  %v152_v26 = vadd.f32 1.0, %v151_v20 }
  0x4b   :  { %v89_v28 = vadd.f32 1.0, %v88_v27 }
  0x4d   :  { %246 = vrcp.f32 %v89_v28  ;;  %v149_v28 = vld [vmem:[#allocation4 + $0x5] sm:$0x1] }
  0x4e   :  { %v158_v31 = vmul.f32 %v149_v28, %v375_v7 }
  0x5a   :  { %v247_v32 = vpop.eup %246 }
  0x5b   :  { %v91_v33 = vmul.f32 %v247_v32, %v87_v30 }
  0x5d   :  { %v93_v35 = vmul.f32 %v91_v33, %v377_v9 }
  0x5f   :  { %v94_v36 = vadd.f32 %v93_v35, %v92_v34 }
  0x61   :  { %v95_v37 = vsub.f32 %v94_v36, %v381_v13 }
  0x63   :  { %v96_v38 = vmax.f32 %v95_v37, 0.0 }
  0x65   :  { %v97_v39 = vmul.f32 %v96_v38, %v384_v16 }
  0x67   :  { %v98_v40 = vadd.f32 %v97_v39, %v386_v18 }
  0x69   :  { %v99_v41 = vmax.f32 %v98_v40, 0.0  ;;  %v173_v40 = vld [vmem:[#allocation7 + $0x5] sm:$0x1] }
  0x6b   :  { %v100_v42 = vmul.f32 %v99_v41, %v390_v21 }
  0x6d   :  { %v101_v44 = vadd.f32 %v100_v42, %v392_v23 }
  0x6f   :  { %103 = vst [vmem:[#allocation9 + $0x2] sm:$0x1] %v101_v44  ;;  %v110_v45 = vmul.f32 %v107_v43, %v101_v44  ;;  %v109_v48 = vmul.f32 %v108_v47, %v101_v44  ;;  %v174_v44 = vadd.f32 1.0, %v173_v40 }
  0x71   :  { %v111_v46 = vadd.f32 1.0, %v110_v45 }
  0x73   :  { %248 = vrcp.f32 %v111_v46  ;;  %v171_v46 = vld [vmem:[#allocation4 + $0x6] sm:$0x1] }
  0x74   :  { %v180_v49 = vmul.f32 %v171_v46, %v375_v7 }
  0x80   :  { %v249_v50 = vpop.eup %248 }
  0x81   :  { %v113_v51 = vmul.f32 %v249_v50, %v109_v48 }
  0x83   :  { %v115_v53 = vmul.f32 %v113_v51, %v377_v9 }
  0x85   :  { %v116_v54 = vadd.f32 %v115_v53, %v114_v52 }
  0x87   :  { %v117_v55 = vsub.f32 %v116_v54, %v381_v13 }
  0x89   :  { %v118_v56 = vmax.f32 %v117_v55, 0.0 }
  0x8b   :  { %v119_v57 = vmul.f32 %v118_v56, %v384_v16 }
  0x8d   :  { %v120_v58 = vadd.f32 %v119_v57, %v386_v18 }
  0x8f   :  { %v121_v59 = vmax.f32 %v120_v58, 0.0  ;;  %v195_v58 = vld [vmem:[#allocation7 + $0x6] sm:$0x1] }
  0x91   :  { %v122_v60 = vmul.f32 %v121_v59, %v390_v21 }
  0x93   :  { %v123_v62 = vadd.f32 %v122_v60, %v392_v23 }
  0x95   :  { %125 = vst [vmem:[#allocation9 + $0x3] sm:$0x1] %v123_v62  ;;  %v132_v63 = vmul.f32 %v129_v61, %v123_v62  ;;  %v131_v2 = vmul.f32 %v130_v1, %v123_v62  ;;  %v196_v62 = vadd.f32 1.0, %v195_v58 }
  0x97   :  { %v133_v0 = vadd.f32 1.0, %v132_v63 }
  0x99   :  { %250 = vrcp.f32 %v133_v0  ;;  %v193_v0 = vld [vmem:[#allocation4 + $0x7] sm:$0x1] }
  0x9a   :  { %v202_v3 = vmul.f32 %v193_v0, %v375_v7 }
  0xa6   :  { %v251_v4 = vpop.eup %250 }
  0xa7   :  { %v135_v5 = vmul.f32 %v251_v4, %v131_v2 }
  0xa9   :  { %v137_v8 = vmul.f32 %v135_v5, %v377_v9 }
  0xab   :  { %v138_v10 = vadd.f32 %v137_v8, %v136_v6 }
  0xad   :  { %v139_v11 = vsub.f32 %v138_v10, %v381_v13 }
  0xaf   :  { %v140_v12 = vmax.f32 %v139_v11, 0.0 }
  0xb1   :  { %v141_v14 = vmul.f32 %v140_v12, %v384_v16 }
  0xb3   :  { %v142_v15 = vadd.f32 %v141_v14, %v386_v18 }
  0xb5   :  { %v143_v17 = vmax.f32 %v142_v15, 0.0 }
  0xb7   :  { %v144_v19 = vmul.f32 %v143_v17, %v390_v21 }
  0xb9   :  { %v145_v22 = vadd.f32 %v144_v19, %v392_v23 }
  0xbb   :  { %147 = vst [vmem:[#allocation9 + $0x4] sm:$0x1] %v145_v22  ;;  %v154_v24 = vmul.f32 %v151_v20, %v145_v22  ;;  %v153_v27 = vmul.f32 %v152_v26, %v145_v22 }
  0xbd   :  { %v155_v25 = vadd.f32 1.0, %v154_v24 }
  0xbf   :  { %252 = vrcp.f32 %v155_v25 }
  0xcc   :  { %v253_v29 = vpop.eup %252 }
  0xcd   :  { %v157_v30 = vmul.f32 %v253_v29, %v153_v27 }
  0xcf   :  { %v159_v32 = vmul.f32 %v157_v30, %v377_v9 }
  0xd1   :  { %v160_v33 = vadd.f32 %v159_v32, %v158_v31 }
  0xd3   :  { %v161_v34 = vsub.f32 %v160_v33, %v381_v13 }
  0xd5   :  { %v162_v35 = vmax.f32 %v161_v34, 0.0 }
  0xd7   :  { %v163_v36 = vmul.f32 %v162_v35, %v384_v16 }
  0xd9   :  { %v164_v37 = vadd.f32 %v163_v36, %v386_v18 }
  0xdb   :  { %v165_v38 = vmax.f32 %v164_v37, 0.0 }
  0xdd   :  { %v166_v39 = vmul.f32 %v165_v38, %v390_v21 }
  0xdf   :  { %v167_v41 = vadd.f32 %v166_v39, %v392_v23 }
  0xe1   :  { %169 = vst [vmem:[#allocation9 + $0x5] sm:$0x1] %v167_v41  ;;  %v176_v42 = vmul.f32 %v173_v40, %v167_v41  ;;  %v175_v45 = vmul.f32 %v174_v44, %v167_v41 }
  0xe3   :  { %v177_v43 = vadd.f32 1.0, %v176_v42 }
  0xe5   :  { %254 = vrcp.f32 %v177_v43 }
  0xf2   :  { %v255_v47 = vpop.eup %254 }
  0xf3   :  { %v179_v48 = vmul.f32 %v255_v47, %v175_v45 }
  0xf5   :  { %v181_v50 = vmul.f32 %v179_v48, %v377_v9 }
  0xf7   :  { %v182_v51 = vadd.f32 %v181_v50, %v180_v49 }
  0xf9   :  { %v183_v52 = vsub.f32 %v182_v51, %v381_v13 }
  0xfb   :  { %v184_v53 = vmax.f32 %v183_v52, 0.0 }
  0xfd   :  { %v185_v54 = vmul.f32 %v184_v53, %v384_v16 }
  0xff   :  { %v186_v55 = vadd.f32 %v185_v54, %v386_v18 }
 0x101   :  { %v187_v56 = vmax.f32 %v186_v55, 0.0 }
 0x103   :  { %v188_v57 = vmul.f32 %v187_v56, %v390_v21 }
 0x105   :  { %v189_v59 = vadd.f32 %v188_v57, %v392_v23 }
 0x107   :  { %191 = vst [vmem:[#allocation9 + $0x6] sm:$0x1] %v189_v59  ;;  %v198_v60 = vmul.f32 %v195_v58, %v189_v59  ;;  %v197_v63 = vmul.f32 %v196_v62, %v189_v59 }
 0x109   :  { %v199_v61 = vadd.f32 1.0, %v198_v60 }
 0x10b   :  { %256 = vrcp.f32 %v199_v61 }
 0x118   :  { %v257_v1 = vpop.eup %256 }
 0x119   :  { %v201_v2 = vmul.f32 %v257_v1, %v197_v63 }
 0x11b   :  { %v203_v4 = vmul.f32 %v201_v2, %v377_v9 }
 0x11d   :  { %v204_v5 = vadd.f32 %v203_v4, %v202_v3 }
 0x11f   :  { %v205_v6 = vsub.f32 %v204_v5, %v381_v13 }
 0x121   :  { %v206_v8 = vmax.f32 %v205_v6, 0.0 }
 0x123   :  { %v207_v10 = vmul.f32 %v206_v8, %v384_v16 }
 0x125   :  { %v208_v11 = vadd.f32 %v207_v10, %v386_v18 }
 0x127   :  { %v209_v12 = vmax.f32 %v208_v11, 0.0 }
 0x129   :  { %v210_v14 = vmul.f32 %v209_v12, %v390_v21 }
 0x12b   :  { %v211_v15 = vadd.f32 %v210_v14, %v392_v23 }
 0x12d   :  { %213 = vst [vmem:[#allocation9 + $0x7] sm:$0x1] %v211_v15 }
 0x12e   :  { %317 = shalt.err (!%p314_p0)
}
 0x12f   :  { %225 = dma.vmem_to_hbm [thread:$0]  %s220_s6, 128, %s447_s3, [#allocation6], %s336_s18, %s336_s18, %s337_s19  }
 0x130   :  { %332 = dma.done.wait [#allocation6], 128  }
 0x131   :  { %333 = vsyncadd [#allocation6], 4294967168 }
 0x132   :  { %229 = vsyncpa [#allocation5], 1 }
 0x133   :  { %230 = vsyncpa [#allocation8], 1 }
 0x134   :  { %231 = vsyncpa [#allocation6], 1 }

</bundles_post_ra>
